<compile_context>
chip_gen: v6e
topology: v6e:2x2x1
jax: 0.10.0
libtpu: 0.0.40
codegen_flags: <defaults>
</compile_context>

<pallas_src>
import functools

import jax
import jax.numpy as jnp
from jax import lax
from jax.experimental import pallas as pl
from jax.experimental.pallas import tpu as pltpu


def _round_up(a: int, b: int) -> int:
    return (a + b - 1) // b * b


def _cdiv(a: int, b: int) -> int:
    return -(-a // b)


def grid_reduction_kernel(ee_ref, eo_ref, oe_ref, oo_ref, w_ref, scale_ref,
                          shift_ref, conv_ref, pool_ref):
    """One (batch n, output-row tile) per grid step.

    ee/eo/oe/oo_ref: (Hp, Wp, Cin) bf16 H/W parity planes of x (whole image,
                     revisited across the row-tile grid axis).
    w_ref:           (9, Cin, Cout_pad) bf16 conv taps (kh-major, kw-minor).
    scale_ref/shift_ref: (1, Cout_pad) f32 folded BatchNorm (eval mode).
    conv_ref:        (TH, Wo_pad, Cout_pad) conv->BN->ReLU output tile.
    pool_ref:        (TH, Wo_pad, Cin)      3x3/stride-2 max-pool output tile.
    """
    th, wo_pad, cout_pad = conv_ref.shape
    cin = pool_ref.shape[-1]
    m = th * wo_pad
    h0 = pl.program_id(1) * th            # first output row of this tile

    planes = ((ee_ref, eo_ref), (oe_ref, oo_ref))

    acc = None                            # (m, Cout_pad) f32 conv accumulator
    pool = None                           # (m, Cin) bf16 running max
    for kh in range(3):
        for kw in range(3):
            p_ref = planes[kh % 2][kw % 2]
            # tap(kh,kw) for output (h, w) == plane[h + kh//2, w + kw//2]
            t = p_ref[pl.ds(h0 + kh // 2, th), pl.ds(kw // 2, wo_pad), :]
            t2 = t.reshape(m, cin)        # lane dim (Cin) untouched
            d = jnp.dot(t2, w_ref[kh * 3 + kw],
                        preferred_element_type=jnp.float32)
            acc = d if acc is None else acc + d
            pool = t2 if pool is None else jnp.maximum(pool, t2)

    conv = jnp.maximum(acc * scale_ref[...] + shift_ref[...], 0.0)
    conv_ref[...] = conv.reshape(th, wo_pad, cout_pad).astype(conv_ref.dtype)
    pool_ref[...] = pool.reshape(th, wo_pad, cin).astype(pool_ref.dtype)


def grid_reduction(x_nchw, w_oihw, gamma, beta, run_mean, run_var, eps=1e-5):
    """x_nchw: (N, Cin, H, W) -> (N, Cout + Cin, Ho, Wo), matching PyTorch."""
    N, Cin, H, W = x_nchw.shape
    Cout = w_oihw.shape[0]
    Ho = (H - 3) // 2 + 1
    Wo = (W - 3) // 2 + 1

    wo_pad = _round_up(Wo, 8)             # sublane-friendly W, free row merges
    cout_pad = _round_up(Cout, 128)       # lane-dense conv stores / MXU N dim

    # Output-row tile: ~256 matmul rows per step; keep >= 2 grid steps so the
    # v7x megacore can shard the parallel grid across both TensorCores.
    th = max(1, min(Ho, max(1, 256 // wo_pad)))
    if N * _cdiv(Ho, th) < 2 and Ho > 1:
        th = _cdiv(Ho, 2)
    n_ht = _cdiv(Ho, th)
    ho_pad = n_ht * th
    Hp = ho_pad + 1                        # +1 row for the kh=2 taps
    Wp = wo_pad + 1                        # +1 col for the kw=2 taps

    # --- one HBM pass: NHWC + bf16 + H/W parity split (space-to-depth) ------
    x_nhwc = jnp.transpose(x_nchw, (0, 2, 3, 1)).astype(jnp.bfloat16)

    def parity_plane(hs, ws):
        p = x_nhwc[:, hs::2, ws::2, :]
        p = p[:, :Hp, :Wp, :]
        return jnp.pad(p, ((0, 0), (0, Hp - p.shape[1]),
                           (0, Wp - p.shape[2]), (0, 0)))

    x_ee = parity_plane(0, 0)
    x_eo = parity_plane(0, 1)
    x_oe = parity_plane(1, 0)
    x_oo = parity_plane(1, 1)

    # Tap-major conv weights: (Cout, Cin, 3, 3) -> (9, Cin, Cout_pad).
    w_k = jnp.transpose(w_oihw, (2, 3, 1, 0)).reshape(9, Cin, Cout)
    w_k = jnp.pad(w_k, ((0, 0), (0, 0), (0, cout_pad - Cout))).astype(jnp.bfloat16)

    # Eval-mode BatchNorm folded into scale/shift (padded channels -> 0).
    inv_std = 1.0 / jnp.sqrt(run_var.astype(jnp.float32) + eps)
    scale = gamma.astype(jnp.float32) * inv_std
    shift = beta.astype(jnp.float32) - run_mean.astype(jnp.float32) * scale
    scale = jnp.pad(scale, (0, cout_pad - Cout)).reshape(1, cout_pad)
    shift = jnp.pad(shift, (0, cout_pad - Cout)).reshape(1, cout_pad)

    # --- VMEM budget for the pipelined working set ---------------------------
    out_itemsize = jnp.dtype(x_nchw.dtype).itemsize
    work_bytes = (
        2 * 4 * Hp * Wp * Cin * 2                          # bf16 planes, 2 bufs
        + 2 * 9 * Cin * cout_pad * 2                       # conv weights
        + 2 * 2 * cout_pad * 4                             # BN scale / shift
        + 2 * th * wo_pad * (cout_pad + Cin) * out_itemsize  # outputs, 2 bufs
        + 9 * th * wo_pad * Cin * 2                        # live tap values
        + 2 * th * wo_pad * cout_pad * 4                   # f32 acc / conv tmp
    )
    vmem_limit = int(min(64 << 20, max(32 << 20, 2 * work_bytes)))

    plane_spec = pl.BlockSpec((None, Hp, Wp, Cin), lambda n, t: (n, 0, 0, 0))

    conv_out, pool_out = pl.pallas_call(
        grid_reduction_kernel,
        out_shape=(
            jax.ShapeDtypeStruct((N, ho_pad, wo_pad, cout_pad), x_nchw.dtype),
            jax.ShapeDtypeStruct((N, ho_pad, wo_pad, Cin), x_nchw.dtype),
        ),
        grid_spec=pltpu.PrefetchScalarGridSpec(
            num_scalar_prefetch=0,
            grid=(N, n_ht),
            in_specs=[
                plane_spec, plane_spec, plane_spec, plane_spec,
                pl.BlockSpec((9, Cin, cout_pad), lambda n, t: (0, 0, 0)),
                pl.BlockSpec((1, cout_pad), lambda n, t: (0, 0)),
                pl.BlockSpec((1, cout_pad), lambda n, t: (0, 0)),
            ],
            out_specs=[
                pl.BlockSpec((None, th, wo_pad, cout_pad), lambda n, t: (n, t, 0, 0)),
                pl.BlockSpec((None, th, wo_pad, Cin), lambda n, t: (n, t, 0, 0)),
            ],
        ),
        compiler_params=pltpu.CompilerParams(
            dimension_semantics=("parallel", "parallel"),
            vmem_limit_bytes=vmem_limit),
    )(x_ee, x_eo, x_oe, x_oo, w_k, scale, shift)

    # Trim padding, fuse torch.cat along channels, and return NCHW.
    conv = conv_out[:, :Ho, :Wo, :Cout]
    pool = pool_out[:, :Ho, :Wo, :]
    out_nhwc = jnp.concatenate([conv, pool], axis=-1)
    return jnp.transpose(out_nhwc, (0, 3, 1, 2))


def grid_reduction_reference(x, w, gamma, beta, run_mean, run_var, eps=1e-5):
    """Pure-JAX reference mirroring the PyTorch module (BN in eval mode)."""
    conv = lax.conv_general_dilated(
        x, w, window_strides=(2, 2), padding="VALID",
        dimension_numbers=("NCHW", "OIHW", "NCHW"))
    inv_std = 1.0 / jnp.sqrt(run_var + eps)
    conv = (conv - run_mean[None, :, None, None]) * inv_std[None, :, None, None]
    conv = conv * gamma[None, :, None, None] + beta[None, :, None, None]
    conv = jnp.maximum(conv, 0.0)
    pool = lax.reduce_window(
        x, -jnp.inf, lax.max,
        window_dimensions=(1, 1, 3, 3), window_strides=(1, 1, 2, 2),
        padding="VALID")
    return jnp.concatenate([conv, pool], axis=1)


if __name__ == "__main__":
    # Small, module-consistent shapes: inp=4 channels, outp=8 channels.
    N, Cin, H, W = 2, 4, 16, 16
    Cout = 8

    key = jax.random.PRNGKey(0)
    kx, kw, kg, kb, km, kv = jax.random.split(key, 6)
    x = jax.random.normal(kx, (N, Cin, H, W), dtype=jnp.float32)
    w = 0.1 * jax.random.normal(kw, (Cout, Cin, 3, 3), dtype=jnp.float32)
    gamma = 1.0 + 0.1 * jax.random.normal(kg, (Cout,), dtype=jnp.float32)
    beta = 0.1 * jax.random.normal(kb, (Cout,), dtype=jnp.float32)
    run_mean = 0.05 * jax.random.normal(km, (Cout,), dtype=jnp.float32)
    run_var = 1.0 + 0.1 * jax.random.uniform(kv, (Cout,), dtype=jnp.float32)

    out = jax.jit(grid_reduction)(x, w, gamma, beta, run_mean, run_var)
    out = jax.block_until_ready(out)

    ref = grid_reduction_reference(x, w, gamma, beta, run_mean, run_var)
    assert out.shape == (N, Cout + Cin, (H - 3) // 2 + 1, (W - 3) // 2 + 1), out.shape
    # bf16 matmul/pool operands -> loosened tolerance vs the f32 reference.
    err = float(jnp.max(jnp.abs(out - ref)))
    assert jnp.allclose(out, ref, atol=5e-2, rtol=5e-2), err

    print("KERNEL_OK")
</pallas_src>

<mosaic_0001>
module attributes {stable_mosaic.version = 11 : i64} {
  func.func @grid_reduction_kernel(%arg0: i32, %arg1: i32, %arg2: memref<1x8x9x4xbf16, #tpu.memory_space<vmem>>, %arg3: memref<1x8x9x4xbf16, #tpu.memory_space<vmem>>, %arg4: memref<1x8x9x4xbf16, #tpu.memory_space<vmem>>, %arg5: memref<1x8x9x4xbf16, #tpu.memory_space<vmem>>, %arg6: memref<9x4x128xbf16, #tpu.memory_space<vmem>>, %arg7: memref<1x128xf32, #tpu.memory_space<vmem>>, %arg8: memref<1x128xf32, #tpu.memory_space<vmem>>, %arg9: memref<1x7x8x128xf32, #tpu.memory_space<vmem>>, %arg10: memref<1x7x8x4xf32, #tpu.memory_space<vmem>>) attributes {dimension_semantics = [#tpu.dimension_semantics<parallel>, #tpu.dimension_semantics<parallel>], iteration_bounds = array<i64: 2, 1>, scalar_prefetch = 0 : i64, scratch_operands = 0 : i64, tpu.core_type = #tpu.core_type<tc>, window_params = [{transform_indices = @transform_0, window_bounds = array<i64: 1, 8, 9, 4>}, {transform_indices = @transform_1, window_bounds = array<i64: 1, 8, 9, 4>}, {transform_indices = @transform_2, window_bounds = array<i64: 1, 8, 9, 4>}, {transform_indices = @transform_3, window_bounds = array<i64: 1, 8, 9, 4>}, {pipeline_mode = #tpu.pipeline_mode<synchronous>, transform_indices = @transform_4, window_bounds = array<i64: 9, 4, 128>}, {pipeline_mode = #tpu.pipeline_mode<synchronous>, transform_indices = @transform_5, window_bounds = array<i64: 1, 128>}, {pipeline_mode = #tpu.pipeline_mode<synchronous>, transform_indices = @transform_6, window_bounds = array<i64: 1, 128>}, {transform_indices = @transform_7, window_bounds = array<i64: 1, 7, 8, 128>}, {transform_indices = @transform_8, window_bounds = array<i64: 1, 7, 8, 4>}]} {
    %c7_i32 = arith.constant 7 : i32
    %0 = arith.muli %arg1, %c7_i32 : i32
    %c0_i32 = arith.constant 0 : i32
    %1 = arith.addi %0, %c0_i32 : i32
    %c0 = arith.constant 0 : index
    %2 = arith.index_cast %1 : i32 to index
    %c0_0 = arith.constant 0 : index
    %c0_1 = arith.constant 0 : index
    %3 = vector.load %arg2[%c0, %2, %c0_0, %c0_1] : memref<1x8x9x4xbf16, #tpu.memory_space<vmem>>, vector<1x7x8x4xbf16>
    %4 = vector.shape_cast %3 : vector<1x7x8x4xbf16> to vector<7x8x4xbf16>
    %5 = vector.shape_cast %4 : vector<7x8x4xbf16> to vector<56x4xbf16>
    %c0_2 = arith.constant 0 : index
    %c0_3 = arith.constant 0 : index
    %c0_4 = arith.constant 0 : index
    %6 = vector.load %arg6[%c0_2, %c0_3, %c0_4] : memref<9x4x128xbf16, #tpu.memory_space<vmem>>, vector<1x4x128xbf16>
    %7 = vector.shape_cast %6 : vector<1x4x128xbf16> to vector<4x128xbf16>
    %cst = arith.constant dense<0.000000e+00> : vector<56x128xf32>
    %8 = tpu.matmul %5, %7, %cst {dimension_numbers = #tpu.dot_dimension_numbers<[1], [0], [0], [1], [0, 0, 1, 1], [], []>} : vector<56x4xbf16>, vector<4x128xbf16>, vector<56x128xf32> -> vector<56x128xf32>
    %c0_i32_5 = arith.constant 0 : i32
    %9 = arith.addi %0, %c0_i32_5 : i32
    %c0_6 = arith.constant 0 : index
    %10 = arith.index_cast %9 : i32 to index
    %c0_7 = arith.constant 0 : index
    %c0_8 = arith.constant 0 : index
    %11 = vector.load %arg3[%c0_6, %10, %c0_7, %c0_8] : memref<1x8x9x4xbf16, #tpu.memory_space<vmem>>, vector<1x7x8x4xbf16>
    %12 = vector.shape_cast %11 : vector<1x7x8x4xbf16> to vector<7x8x4xbf16>
    %13 = vector.shape_cast %12 : vector<7x8x4xbf16> to vector<56x4xbf16>
    %c1 = arith.constant 1 : index
    %c0_9 = arith.constant 0 : index
    %c0_10 = arith.constant 0 : index
    %14 = vector.load %arg6[%c1, %c0_9, %c0_10] : memref<9x4x128xbf16, #tpu.memory_space<vmem>>, vector<1x4x128xbf16>
    %15 = vector.shape_cast %14 : vector<1x4x128xbf16> to vector<4x128xbf16>
    %cst_11 = arith.constant dense<0.000000e+00> : vector<56x128xf32>
    %16 = tpu.matmul %13, %15, %cst_11 {dimension_numbers = #tpu.dot_dimension_numbers<[1], [0], [0], [1], [0, 0, 1, 1], [], []>} : vector<56x4xbf16>, vector<4x128xbf16>, vector<56x128xf32> -> vector<56x128xf32>
    %17 = arith.addf %8, %16 : vector<56x128xf32>
    %18 = arith.maximumf %5, %13 : vector<56x4xbf16>
    %c0_i32_12 = arith.constant 0 : i32
    %19 = arith.addi %0, %c0_i32_12 : i32
    %c0_13 = arith.constant 0 : index
    %20 = arith.index_cast %19 : i32 to index
    %c1_14 = arith.constant 1 : index
    %c0_15 = arith.constant 0 : index
    %21 = vector.load %arg2[%c0_13, %20, %c1_14, %c0_15] : memref<1x8x9x4xbf16, #tpu.memory_space<vmem>>, vector<1x7x8x4xbf16>
    %22 = vector.shape_cast %21 : vector<1x7x8x4xbf16> to vector<7x8x4xbf16>
    %23 = vector.shape_cast %22 : vector<7x8x4xbf16> to vector<56x4xbf16>
    %c2 = arith.constant 2 : index
    %c0_16 = arith.constant 0 : index
    %c0_17 = arith.constant 0 : index
    %24 = vector.load %arg6[%c2, %c0_16, %c0_17] : memref<9x4x128xbf16, #tpu.memory_space<vmem>>, vector<1x4x128xbf16>
    %25 = vector.shape_cast %24 : vector<1x4x128xbf16> to vector<4x128xbf16>
    %cst_18 = arith.constant dense<0.000000e+00> : vector<56x128xf32>
    %26 = tpu.matmul %23, %25, %cst_18 {dimension_numbers = #tpu.dot_dimension_numbers<[1], [0], [0], [1], [0, 0, 1, 1], [], []>} : vector<56x4xbf16>, vector<4x128xbf16>, vector<56x128xf32> -> vector<56x128xf32>
    %27 = arith.addf %17, %26 : vector<56x128xf32>
    %28 = arith.maximumf %18, %23 : vector<56x4xbf16>
    %c0_i32_19 = arith.constant 0 : i32
    %29 = arith.addi %0, %c0_i32_19 : i32
    %c0_20 = arith.constant 0 : index
    %30 = arith.index_cast %29 : i32 to index
    %c0_21 = arith.constant 0 : index
    %c0_22 = arith.constant 0 : index
    %31 = vector.load %arg4[%c0_20, %30, %c0_21, %c0_22] : memref<1x8x9x4xbf16, #tpu.memory_space<vmem>>, vector<1x7x8x4xbf16>
    %32 = vector.shape_cast %31 : vector<1x7x8x4xbf16> to vector<7x8x4xbf16>
    %33 = vector.shape_cast %32 : vector<7x8x4xbf16> to vector<56x4xbf16>
    %c3 = arith.constant 3 : index
    %c0_23 = arith.constant 0 : index
    %c0_24 = arith.constant 0 : index
    %34 = vector.load %arg6[%c3, %c0_23, %c0_24] : memref<9x4x128xbf16, #tpu.memory_space<vmem>>, vector<1x4x128xbf16>
    %35 = vector.shape_cast %34 : vector<1x4x128xbf16> to vector<4x128xbf16>
    %cst_25 = arith.constant dense<0.000000e+00> : vector<56x128xf32>
    %36 = tpu.matmul %33, %35, %cst_25 {dimension_numbers = #tpu.dot_dimension_numbers<[1], [0], [0], [1], [0, 0, 1, 1], [], []>} : vector<56x4xbf16>, vector<4x128xbf16>, vector<56x128xf32> -> vector<56x128xf32>
    %37 = arith.addf %27, %36 : vector<56x128xf32>
    %38 = arith.maximumf %28, %33 : vector<56x4xbf16>
    %c0_i32_26 = arith.constant 0 : i32
    %39 = arith.addi %0, %c0_i32_26 : i32
    %c0_27 = arith.constant 0 : index
    %40 = arith.index_cast %39 : i32 to index
    %c0_28 = arith.constant 0 : index
    %c0_29 = arith.constant 0 : index
    %41 = vector.load %arg5[%c0_27, %40, %c0_28, %c0_29] : memref<1x8x9x4xbf16, #tpu.memory_space<vmem>>, vector<1x7x8x4xbf16>
    %42 = vector.shape_cast %41 : vector<1x7x8x4xbf16> to vector<7x8x4xbf16>
    %43 = vector.shape_cast %42 : vector<7x8x4xbf16> to vector<56x4xbf16>
    %c4 = arith.constant 4 : index
    %c0_30 = arith.constant 0 : index
    %c0_31 = arith.constant 0 : index
    %44 = vector.load %arg6[%c4, %c0_30, %c0_31] : memref<9x4x128xbf16, #tpu.memory_space<vmem>>, vector<1x4x128xbf16>
    %45 = vector.shape_cast %44 : vector<1x4x128xbf16> to vector<4x128xbf16>
    %cst_32 = arith.constant dense<0.000000e+00> : vector<56x128xf32>
    %46 = tpu.matmul %43, %45, %cst_32 {dimension_numbers = #tpu.dot_dimension_numbers<[1], [0], [0], [1], [0, 0, 1, 1], [], []>} : vector<56x4xbf16>, vector<4x128xbf16>, vector<56x128xf32> -> vector<56x128xf32>
    %47 = arith.addf %37, %46 : vector<56x128xf32>
    %48 = arith.maximumf %38, %43 : vector<56x4xbf16>
    %c0_i32_33 = arith.constant 0 : i32
    %49 = arith.addi %0, %c0_i32_33 : i32
    %c0_34 = arith.constant 0 : index
    %50 = arith.index_cast %49 : i32 to index
    %c1_35 = arith.constant 1 : index
    %c0_36 = arith.constant 0 : index
    %51 = vector.load %arg4[%c0_34, %50, %c1_35, %c0_36] : memref<1x8x9x4xbf16, #tpu.memory_space<vmem>>, vector<1x7x8x4xbf16>
    %52 = vector.shape_cast %51 : vector<1x7x8x4xbf16> to vector<7x8x4xbf16>
    %53 = vector.shape_cast %52 : vector<7x8x4xbf16> to vector<56x4xbf16>
    %c5 = arith.constant 5 : index
    %c0_37 = arith.constant 0 : index
    %c0_38 = arith.constant 0 : index
    %54 = vector.load %arg6[%c5, %c0_37, %c0_38] : memref<9x4x128xbf16, #tpu.memory_space<vmem>>, vector<1x4x128xbf16>
    %55 = vector.shape_cast %54 : vector<1x4x128xbf16> to vector<4x128xbf16>
    %cst_39 = arith.constant dense<0.000000e+00> : vector<56x128xf32>
    %56 = tpu.matmul %53, %55, %cst_39 {dimension_numbers = #tpu.dot_dimension_numbers<[1], [0], [0], [1], [0, 0, 1, 1], [], []>} : vector<56x4xbf16>, vector<4x128xbf16>, vector<56x128xf32> -> vector<56x128xf32>
    %57 = arith.addf %47, %56 : vector<56x128xf32>
    %58 = arith.maximumf %48, %53 : vector<56x4xbf16>
    %c1_i32 = arith.constant 1 : i32
    %59 = arith.addi %0, %c1_i32 : i32
    %c0_40 = arith.constant 0 : index
    %60 = arith.index_cast %59 : i32 to index
    %c0_41 = arith.constant 0 : index
    %c0_42 = arith.constant 0 : index
    %61 = vector.load %arg2[%c0_40, %60, %c0_41, %c0_42] : memref<1x8x9x4xbf16, #tpu.memory_space<vmem>>, vector<1x7x8x4xbf16>
    %62 = vector.shape_cast %61 : vector<1x7x8x4xbf16> to vector<7x8x4xbf16>
    %63 = vector.shape_cast %62 : vector<7x8x4xbf16> to vector<56x4xbf16>
    %c6 = arith.constant 6 : index
    %c0_43 = arith.constant 0 : index
    %c0_44 = arith.constant 0 : index
    %64 = vector.load %arg6[%c6, %c0_43, %c0_44] : memref<9x4x128xbf16, #tpu.memory_space<vmem>>, vector<1x4x128xbf16>
    %65 = vector.shape_cast %64 : vector<1x4x128xbf16> to vector<4x128xbf16>
    %cst_45 = arith.constant dense<0.000000e+00> : vector<56x128xf32>
    %66 = tpu.matmul %63, %65, %cst_45 {dimension_numbers = #tpu.dot_dimension_numbers<[1], [0], [0], [1], [0, 0, 1, 1], [], []>} : vector<56x4xbf16>, vector<4x128xbf16>, vector<56x128xf32> -> vector<56x128xf32>
    %67 = arith.addf %57, %66 : vector<56x128xf32>
    %68 = arith.maximumf %58, %63 : vector<56x4xbf16>
    %c1_i32_46 = arith.constant 1 : i32
    %69 = arith.addi %0, %c1_i32_46 : i32
    %c0_47 = arith.constant 0 : index
    %70 = arith.index_cast %69 : i32 to index
    %c0_48 = arith.constant 0 : index
    %c0_49 = arith.constant 0 : index
    %71 = vector.load %arg3[%c0_47, %70, %c0_48, %c0_49] : memref<1x8x9x4xbf16, #tpu.memory_space<vmem>>, vector<1x7x8x4xbf16>
    %72 = vector.shape_cast %71 : vector<1x7x8x4xbf16> to vector<7x8x4xbf16>
    %73 = vector.shape_cast %72 : vector<7x8x4xbf16> to vector<56x4xbf16>
    %c7 = arith.constant 7 : index
    %c0_50 = arith.constant 0 : index
    %c0_51 = arith.constant 0 : index
    %74 = vector.load %arg6[%c7, %c0_50, %c0_51] : memref<9x4x128xbf16, #tpu.memory_space<vmem>>, vector<1x4x128xbf16>
    %75 = vector.shape_cast %74 : vector<1x4x128xbf16> to vector<4x128xbf16>
    %cst_52 = arith.constant dense<0.000000e+00> : vector<56x128xf32>
    %76 = tpu.matmul %73, %75, %cst_52 {dimension_numbers = #tpu.dot_dimension_numbers<[1], [0], [0], [1], [0, 0, 1, 1], [], []>} : vector<56x4xbf16>, vector<4x128xbf16>, vector<56x128xf32> -> vector<56x128xf32>
    %77 = arith.addf %67, %76 : vector<56x128xf32>
    %78 = arith.maximumf %68, %73 : vector<56x4xbf16>
    %c1_i32_53 = arith.constant 1 : i32
    %79 = arith.addi %0, %c1_i32_53 : i32
    %c0_54 = arith.constant 0 : index
    %80 = arith.index_cast %79 : i32 to index
    %c1_55 = arith.constant 1 : index
    %c0_56 = arith.constant 0 : index
    %81 = vector.load %arg2[%c0_54, %80, %c1_55, %c0_56] : memref<1x8x9x4xbf16, #tpu.memory_space<vmem>>, vector<1x7x8x4xbf16>
    %82 = vector.shape_cast %81 : vector<1x7x8x4xbf16> to vector<7x8x4xbf16>
    %83 = vector.shape_cast %82 : vector<7x8x4xbf16> to vector<56x4xbf16>
    %c8 = arith.constant 8 : index
    %c0_57 = arith.constant 0 : index
    %c0_58 = arith.constant 0 : index
    %84 = vector.load %arg6[%c8, %c0_57, %c0_58] : memref<9x4x128xbf16, #tpu.memory_space<vmem>>, vector<1x4x128xbf16>
    %85 = vector.shape_cast %84 : vector<1x4x128xbf16> to vector<4x128xbf16>
    %cst_59 = arith.constant dense<0.000000e+00> : vector<56x128xf32>
    %86 = tpu.matmul %83, %85, %cst_59 {dimension_numbers = #tpu.dot_dimension_numbers<[1], [0], [0], [1], [0, 0, 1, 1], [], []>} : vector<56x4xbf16>, vector<4x128xbf16>, vector<56x128xf32> -> vector<56x128xf32>
    %87 = arith.addf %77, %86 : vector<56x128xf32>
    %88 = arith.maximumf %78, %83 : vector<56x4xbf16>
    %c0_60 = arith.constant 0 : index
    %c0_61 = arith.constant 0 : index
    %89 = vector.load %arg7[%c0_60, %c0_61] : memref<1x128xf32, #tpu.memory_space<vmem>>, vector<1x128xf32>
    %90 = vector.broadcast %89 : vector<1x128xf32> to vector<56x128xf32>
    %91 = arith.mulf %87, %90 : vector<56x128xf32>
    %c0_62 = arith.constant 0 : index
    %c0_63 = arith.constant 0 : index
    %92 = vector.load %arg8[%c0_62, %c0_63] : memref<1x128xf32, #tpu.memory_space<vmem>>, vector<1x128xf32>
    %93 = vector.broadcast %92 : vector<1x128xf32> to vector<56x128xf32>
    %94 = arith.addf %91, %93 : vector<56x128xf32>
    %cst_64 = arith.constant 0.000000e+00 : f32
    %95 = vector.broadcast %cst_64 : f32 to vector<56x128xf32>
    %96 = arith.maximumf %94, %95 : vector<56x128xf32>
    %97 = vector.shape_cast %96 : vector<56x128xf32> to vector<7x8x128xf32>
    %c0_65 = arith.constant 0 : index
    %c0_66 = arith.constant 0 : index
    %c0_67 = arith.constant 0 : index
    %c0_68 = arith.constant 0 : index
    %98 = vector.load %arg9[%c0_65, %c0_66, %c0_67, %c0_68] : memref<1x7x8x128xf32, #tpu.memory_space<vmem>>, vector<1x7x8x128xf32>
    %99 = vector.shape_cast %98 : vector<1x7x8x128xf32> to vector<7x8x128xf32>
    %100 = vector.shape_cast %97 : vector<7x8x128xf32> to vector<1x7x8x128xf32>
    tpu.vector_store %arg9[%c0_65, %c0_66, %c0_67, %c0_68], %100 {strides = array<i32>} : memref<1x7x8x128xf32, #tpu.memory_space<vmem>>, vector<1x7x8x128xf32>,
    %101 = vector.shape_cast %88 : vector<56x4xbf16> to vector<7x8x4xbf16>
    %102 = arith.extf %101 : vector<7x8x4xbf16> to vector<7x8x4xf32>
    %c0_69 = arith.constant 0 : index
    %c0_70 = arith.constant 0 : index
    %c0_71 = arith.constant 0 : index
    %c0_72 = arith.constant 0 : index
    %103 = vector.load %arg10[%c0_69, %c0_70, %c0_71, %c0_72] : memref<1x7x8x4xf32, #tpu.memory_space<vmem>>, vector<1x7x8x4xf32>
    %104 = vector.shape_cast %103 : vector<1x7x8x4xf32> to vector<7x8x4xf32>
    %105 = vector.shape_cast %102 : vector<7x8x4xf32> to vector<1x7x8x4xf32>
    tpu.vector_store %arg10[%c0_69, %c0_70, %c0_71, %c0_72], %105 {strides = array<i32>} : memref<1x7x8x4xf32, #tpu.memory_space<vmem>>, vector<1x7x8x4xf32>,
    return
  }
  func.func @transform_0(%arg0: i32, %arg1: i32) -> (i32, i32, i32, i32) {
    %c0_i32 = arith.constant 0 : i32
    %c0_i32_0 = arith.constant 0 : i32
    %c0_i32_1 = arith.constant 0 : i32
    %c0_i32_2 = arith.constant 0 : i32
    return %arg0, %c0_i32, %c0_i32_0, %c0_i32_1 : i32, i32, i32, i32
  }
  func.func @transform_1(%arg0: i32, %arg1: i32) -> (i32, i32, i32, i32) {
    %c0_i32 = arith.constant 0 : i32
    %c0_i32_0 = arith.constant 0 : i32
    %c0_i32_1 = arith.constant 0 : i32
    %c0_i32_2 = arith.constant 0 : i32
    return %arg0, %c0_i32, %c0_i32_0, %c0_i32_1 : i32, i32, i32, i32
  }
  func.func @transform_2(%arg0: i32, %arg1: i32) -> (i32, i32, i32, i32) {
    %c0_i32 = arith.constant 0 : i32
    %c0_i32_0 = arith.constant 0 : i32
    %c0_i32_1 = arith.constant 0 : i32
    %c0_i32_2 = arith.constant 0 : i32
    return %arg0, %c0_i32, %c0_i32_0, %c0_i32_1 : i32, i32, i32, i32
  }
  func.func @transform_3(%arg0: i32, %arg1: i32) -> (i32, i32, i32, i32) {
    %c0_i32 = arith.constant 0 : i32
    %c0_i32_0 = arith.constant 0 : i32
    %c0_i32_1 = arith.constant 0 : i32
    %c0_i32_2 = arith.constant 0 : i32
    return %arg0, %c0_i32, %c0_i32_0, %c0_i32_1 : i32, i32, i32, i32
  }
  func.func @transform_4(%arg0: i32, %arg1: i32) -> (i32, i32, i32) {
    %c0_i32 = arith.constant 0 : i32
    %c0_i32_0 = arith.constant 0 : i32
    %c0_i32_1 = arith.constant 0 : i32
    %c0_i32_2 = arith.constant 0 : i32
    return %c0_i32, %c0_i32_0, %c0_i32_1 : i32, i32, i32
  }
  func.func @transform_5(%arg0: i32, %arg1: i32) -> (i32, i32) {
    %c0_i32 = arith.constant 0 : i32
    %c0_i32_0 = arith.constant 0 : i32
    %c0_i32_1 = arith.constant 0 : i32
    return %c0_i32, %c0_i32_0 : i32, i32
  }
  func.func @transform_6(%arg0: i32, %arg1: i32) -> (i32, i32) {
    %c0_i32 = arith.constant 0 : i32
    %c0_i32_0 = arith.constant 0 : i32
    %c0_i32_1 = arith.constant 0 : i32
    return %c0_i32, %c0_i32_0 : i32, i32
  }
  func.func @transform_7(%arg0: i32, %arg1: i32) -> (i32, i32, i32, i32) {
    %c0_i32 = arith.constant 0 : i32
    %c0_i32_0 = arith.constant 0 : i32
    %c0_i32_1 = arith.constant 0 : i32
    return %arg0, %arg1, %c0_i32, %c0_i32_0 : i32, i32, i32, i32
  }
  func.func @transform_8(%arg0: i32, %arg1: i32) -> (i32, i32, i32, i32) {
    %c0_i32 = arith.constant 0 : i32
    %c0_i32_0 = arith.constant 0 : i32
    %c0_i32_1 = arith.constant 0 : i32
    return %arg0, %arg1, %c0_i32, %c0_i32_0 : i32, i32, i32, i32
  }
}

</mosaic_0001>

<bundles_post_ra>
// kernel: grid_reduction.1
= control target key start
LH: loop header
LB: loop body
LE: loop exit
PB: predicated region body
PF: predicated region fallthrough
CT: control target
= control target key end

     0   :  { %s2443_s27 = smov 0   ;;  %s2445_s28 = smov 0   ;;  %s3126_s0 = inlined_call_operand.vmem [shape: bf16[2,8,9,4], index: 0, kind: input, shape index: {}]   ;;  %s3127_s1 = inlined_call_operand.vmem [shape: bf16[2,8,9,4], index: 1, kind: input, shape index: {}]   ;;  %s3128_s2 = inlined_call_operand.vmem [shape: bf16[2,8,9,4], index: 2, kind: input, shape index: {}]   ;;  %s3129_s3 = inlined_call_operand.vmem [shape: bf16[2,8,9,4], index: 3, kind: input, shape index: {}]   ;;  %s3130_s4 = inlined_call_operand.vmem [shape: bf16[9,4,128], index: 4, kind: input, shape index: {}]   ;;  %s3131_s5 = inlined_call_operand.vmem [shape: f32[1,128], index: 5, kind: input, shape index: {}]   ;;  %s3132_s6 = inlined_call_operand.vmem [shape: f32[1,128], index: 6, kind: input, shape index: {}]   ;;  %s3133_s7 = inlined_call_operand.vmem [shape: f32[2,7,8,128], index: 7, kind: output, shape index: {0}]   ;;  %s3134_s8 = inlined_call_operand.vmem [shape: f32[2,7,8,4], index: 8, kind: output, shape index: {1}]  }
   0x1   :  { %s2447_s29 = smov 0  }
   0x2 LB: > { %s31_s30 = sadd.s32 1, %s2392_s28  ;;  %p2051_p0 = scmp.ge.s32.totalorder %s2396_s29, 1  ;;  %s2396_s29 = sphi %s2447_s29, %s19_s29   ;;  %s2392_s28 = sphi %s2445_s28, %s3138_s28   ;;  %s2388_s27 = sphi %s2443_s27, %s3137_s27  }
   0x3   : > { %p33_p1 = scmp.ge.s32.totalorder %s31_s30, 2  ;;  %p311_p2 = scmp.lt.s32.totalorder %s2396_s29, 3 }
   0x5   : > { %s3140_s30 = smov (%p33_p1, %s31_s30), 0  ;;  %p312_p3 = pnand %p2051_p0, %p311_p2 }
   0x6   : > { %p373_p4 = scmp.lt.s32.totalorder (!%p312_p3), %s2388_s27, 1 }
   0x7   : > { %315 = sbr.rel (%p312_p3) target bundleno = 314 (0x13a), region = 48 }
   0xc   : > { %v2062_v0 = vld [vmem:[%s3130_s4 + $0x2] sm:$0x3]  ;;  %vm468_vm0 = vcmask 1041408   ;;  %s3142_s27 = smov (!%p373_p4, %s2388_s27), 1  ;;  %v425_v2 = vld [vmem:[%s3130_s4] sm:$0x3] }
   0xd   : > { %2316 = vmatprep.subr.msk.bf16.mxu1 %vm468_vm0, %v2062_v0  ;;  %2315 = vmatprep.subr.msk.bf16.mxu0 %vm468_vm0, %v2062_v0  ;;  %v470_v1 = vsel %vm468_vm0, %v2062_v0, 0  ;;  %v2079_v3 = vld [vmem:[%s3130_s4 + $0x4] sm:$0x3]  ;;  %s2478_s15 = sshll.u32 %s3142_s27, 6  ;;  %vm455_vm1 = vcmask 31744   ;;  %v2493_v4 = vsel %vm468_vm0, %v425_v2, 0 }
   0xe   : > { %2314 = vmatpush3.bf16.msra.mxu1 %v470_v1  ;;  %2224 = vmatpush3.bf16.msra.mxu0 %v470_v1  ;;  %s2484_s18 = scalar_lea.vmem %s3126_s0, %s2478_s15  ;;  %s2490_s21 = scalar_lea.vmem %s3127_s1, %s2478_s15  ;;  %vm654_vm2 = vsmask.f32 3328  ;;  %vm655_vm3 = vsmask.f32 7440  ;;  %v2498_v5 = vld [vmem:[%s3130_s4 + $0x6] sm:$0x3] }
   0xf   : > { %2317 = vmatprep.subr.msk.bf16.mxu1 %vm468_vm0, %v425_v2  ;;  %2318 = vmatprep.subr.msk.bf16.mxu0 %vm468_vm0, %v2079_v3  ;;  %v2501_v6 = vld [vmem:[%s2490_s21] sm:$0xf]  ;;  %v2506_v7 = vld [vmem:[%s3130_s4 + $0x8] sm:$0x3]  ;;  %v2511_v8 = vld [vmem:[%s3130_s4 + $0xa] sm:$0x3]  ;;  %s2536_s12 = scalar_lea.vmem %s3128_s2, %s2478_s15  ;;  %s2659_s16 = scalar_lea.vmem %s3129_s3, %s2478_s15 }
  0x10   : > { %v2514_v9 = vld [vmem:[%s2490_s21 + $0x8] sm:$0xf]  ;;  %v640_v10 = vld [vmem:[%s2484_s18] sm:$0xf]  ;;  %v641_v11 = vld [vmem:[%s2484_s18 + $0x4] sm:$0x1] }
  0x11   : > { %v2063_v12 = vcombine.low %v2501_v6, %v2514_v9  ;;  %v642_v13 = vld [vmem:[%s2484_s18 + $0x8] sm:$0xf]  ;;  %v643_v14 = vld [vmem:[%s2484_s18 + $0xc] sm:$0x1]  ;;  %v658_v15 = vshrl.u32 %v640_v10, 16  ;;  %v661_v16 = vshll.u32 %v640_v10, 16  ;;  %vm2581_vm4 = vmor %vm654_vm2, %vm655_vm3 }
  0x12   : > { %v2523_v17 = vld [vmem:[%s2484_s18] sm:$0xf]  ;;  %v672_v18 = vshrl.u32 %v642_v13, 16  ;;  %v675_v19 = vshll.u32 %v642_v13, 16  ;;  %v2526_v20 = vsel %vm468_vm0, %v2079_v3, 0  ;;  %v2530_v21 = vsel %vm468_vm0, %v2498_v5, 0 }
  0x13   : > { %v2539_v22 = vld [vmem:[%s2484_s18 + $0x8] sm:$0xf]  ;;  %2225 = vmatprep.mubr.msk.bf16.mxu0 %vm455_vm1, %v2063_v12  ;;  %v660_v23 = vrot.slane %v658_v15, 4  ;;  %v663_v24 = vrot.slane %v661_v16, 5  ;;  %v667_v25 = vshll.u32 %v641_v11, 16  ;;  %v2544_v26 = vsel %vm468_vm0, %v2506_v7, 0 }
  0x14   : > { %v674_v27 = vrot.slane %v672_v18, 4  ;;  %v677_v28 = vrot.slane %v675_v19, 5  ;;  %v681_v29 = vshll.u32 %v643_v14, 16  ;;  %v2548_v30 = vsel %vm468_vm0, %v2511_v8, 0  ;;  %v2551_v32 = vld [vmem:[%s2490_s21 + $0x20] sm:$0xf] }
  0x15   : > { %v664_v31 = vor.u32 %v663_v24, %v660_v23  ;;  %v2554_v33 = vld [vmem:[%s2490_s21 + $0x28] sm:$0xf]  ;;  %v648_v34 = vld [vmem:[%s2484_s18 + $0x20] sm:$0xf]  ;;  %v2071_v35 = vcombine.low %v2523_v17, %v2539_v22  ;;  %v633_v36 = vmax.bf16 %v2501_v6, %v2523_v17  ;;  %v649_v41 = vld [vmem:[%s2484_s18 + $0x24] sm:$0x1]  ;;  %v634_v59 = vmax.bf16 %v2514_v9, %v2539_v22 }
  0x16   : > { %v678_v37 = vor.u32 %v677_v28, %v674_v27  ;;  %v2562_v38 = vld [vmem:[%s2536_s12] sm:$0xf]  ;;  %v2565_v39 = vld [vmem:[%s2536_s12 + $0x8] sm:$0xf]  ;;  %v2065_v40 = vcombine.low %v2551_v32, %v2554_v33  ;;  %v651_v43 = vld [vmem:[%s2484_s18 + $0x2c] sm:$0x1] }
  0x17   : > { %v650_v42 = vld [vmem:[%s2484_s18 + $0x28] sm:$0xf]  ;;  %v669_v44 = vrot.slane %v667_v25, 5  ;;  %v2573_v45 = vld [vmem:[%s2484_s18 + $0x20] sm:$0xf]  ;;  %v714_v46 = vshrl.u32 %v648_v34, 16  ;;  %v2089_v10 = vcombine.low %v2562_v38, %v2565_v39 }
  0x18   : > { %v717_v47 = vshll.u32 %v648_v34, 16  ;;  %v723_v48 = vshll.u32 %v649_v41, 16  ;;  %v665_v49 = vrot.slane %v664_v31, 4  ;;  %v683_v50 = vrot.slane %v681_v29, 5  ;;  %v2576_v51 = vld [vmem:[%s2484_s18 + $0x28] sm:$0xf]  ;;  %2229 = vmatprep.mubr.msk.bf16.mxu1 %vm455_vm1, %v2065_v40 }
  0x19   : > { %v728_v52 = vshrl.u32 %v650_v42, 16  ;;  %v731_v53 = vshll.u32 %v650_v42, 16  ;;  %v679_v55 = vrot.slane %v678_v37, 4  ;;  %v716_v56 = vrot.slane %v714_v46, 4  ;;  %v2588_v63 = vld [vmem:[%s2490_s21 + $0x10] sm:$0xf] }
  0x1a   : > { %v719_v57 = vrot.slane %v717_v47, 5  ;;  %v737_v58 = vshll.u32 %v651_v43, 16  ;;  %v725_v60 = vrot.slane %v723_v48, 5  ;;  %v2073_v0 = vcombine.low %v2573_v45, %v2576_v51  ;;  %v2595_v3 = vld [vmem:[%s2484_s18 + $0x10] sm:$0xf]  ;;  %s2325_s24 = smul.u32 56, %s3142_s27 }
  0x1b   : > { %v730_v61 = vrot.slane %v728_v52, 4  ;;  %v733_v62 = vrot.slane %v731_v53, 5  ;;  %v637_v1 = vmax.bf16 %v2551_v32, %v2573_v45  ;;  %v2598_v6 = vld [vmem:[%s2490_s21 + $0x18] sm:$0xf]  ;;  %v644_v9 = vld [vmem:[%s2484_s18 + $0x10] sm:$0xf]  ;;  %v2605_v11 = vsel %vm2581_vm4, %v665_v49, %v669_v44 }
  0x1c   : > { %v720_v2 = vor.u32 %v719_v57, %v716_v56  ;;  %v638_v12 = vmax.bf16 %v2554_v33, %v2576_v51  ;;  %v2064_v14 = vcombine.low %v2588_v63, %v2598_v6  ;;  %v645_v15 = vld [vmem:[%s2484_s18 + $0x14] sm:$0x1]  ;;  %v646_v16 = vld [vmem:[%s2484_s18 + $0x18] sm:$0xf]  ;;  %v647_v18 = vld [vmem:[%s2484_s18 + $0x1c] sm:$0x1]  ;;  %v2616_v19 = vsel %vm2581_vm4, %v679_v55, %v683_v50  ;;  %s3005_s9 = scalar_lea.vmem %s3134_s8, %s2325_s24  ;;  %s3108_s14 = scalar_lea.vmem %s3133_s7, %s2325_s24 }
  0x1d   : > { %v734_v13 = vor.u32 %v733_v62, %v730_v61  ;;  %v739_v24 = vrot.slane %v737_v58, 5  ;;  %v2619_v25 = vld [vmem:[%s2484_s18 + $0x18] sm:$0xf]  ;;  %v686_v27 = vshrl.u32 %v644_v9, 16  ;;  %v689_v29 = vshll.u32 %v644_v9, 16 }
  0x1e   : > { %v721_v23 = vrot.slane %v720_v2, 4  ;;  %2226 = vmatmul.mubr.msk.bf16.vlgmr.msra.gmra.mxu0 %vm455_vm1, %v2064_v14  ;;  %v695_v31 = vshll.u32 %v645_v15, 16  ;;  %v700_v32 = vshrl.u32 %v646_v16, 16  ;;  %v2623_v33 = vmax.bf16 %v2605_v11, %v633_v36  ;;  %v1116_v46 = vld [vmem:[%s2536_s12 + $0x10] sm:$0xf] }
  0x1f   : > { %v735_v28 = vrot.slane %v734_v13, 4  ;;  %v688_v34 = vrot.slane %v686_v27, 4  ;;  %v703_v37 = vshll.u32 %v646_v16, 16  ;;  %v709_v40 = vshll.u32 %v647_v18, 16  ;;  %2244 = vmatpush3.bf16.msra.mxu0 %v2526_v20  ;;  %v1118_v49 = vld [vmem:[%s2536_s12 + $0x18] sm:$0xf] }
  0x20   : > { %v2627_v41 = vmax.bf16 %v2616_v19, %v634_v59  ;;  %v2072_v42 = vcombine.low %v2595_v3, %v2619_v25  ;;  %v635_v43 = vmax.bf16 %v2588_v63, %v2595_v3  ;;  %v691_v44 = vrot.slane %v689_v29, 5  ;;  %2320 = vmatprep.subr.msk.bf16.mxu0 %vm468_vm0, %v2506_v7  ;;  %v1117_v55 = vld [vmem:[%s2536_s12 + $0x14] sm:$0x1]  ;;  %v1119_v7 = vld [vmem:[%s2536_s12 + $0x1c] sm:$0x1] }
  0x21   : > { %v2638_v36 = vsel %vm2581_vm4, %v721_v23, %v725_v60  ;;  %v636_v20 = vmax.bf16 %v2598_v6, %v2619_v25  ;;  %v702_v47 = vrot.slane %v700_v32, 4  ;;  %v705_v48 = vrot.slane %v703_v37, 5  ;;  %v2653_v61 = vld [vmem:[%s2490_s21 + $0x30] sm:$0xf]  ;;  %v2675_v37 = vld [vmem:[%s2536_s12 + $0x18] sm:$0xf] }
  0x22   : > { %v2645_v50 = vsel %vm2581_vm4, %v735_v28, %v739_v24  ;;  %v692_v52 = vor.u32 %v691_v44, %v688_v34  ;;  %v697_v53 = vrot.slane %v695_v31, 5  ;;  %v1155_v56 = vshrl.u32 %v1116_v46, 16  ;;  %v652_v31 = vld [vmem:[%s2484_s18 + $0x30] sm:$0xf] }
  0x23   : > { %v2650_v57 = vmax.bf16 %v2638_v36, %v637_v1  ;;  %v706_v58 = vor.u32 %v705_v48, %v702_v47  ;;  %v711_v59 = vrot.slane %v709_v40, 5  ;;  %v1158_v60 = vshll.u32 %v1116_v46, 16  ;;  %v2672_v34 = vld [vmem:[%s2536_s12 + $0x10] sm:$0xf]  ;;  %v653_v46 = vld [vmem:[%s2484_s18 + $0x34] sm:$0x1] }
  0x24   : > { %v693_v62 = vrot.slane %v692_v52, 4  ;;  %v1157_v63 = vrot.slane %v1155_v56, 4  ;;  %v1169_v2 = vshrl.u32 %v1118_v49, 16  ;;  %v1172_v6 = vshll.u32 %v1118_v49, 16  ;;  %v2685_v47 = vld [vmem:[%s2536_s12 + $0x20] sm:$0xf] }
  0x25   : > { %v707_v9 = vrot.slane %v706_v58, 4  ;;  %v1160_v13 = vrot.slane %v1158_v60, 5  ;;  %v1164_v14 = vshll.u32 %v1117_v55, 16  ;;  %v1178_v15 = vshll.u32 %v1119_v7, 16  ;;  %v2689_v48 = vld [vmem:[%s2659_s16 + $0x10] sm:$0xf] }
  0x26   : > { %v698_v1 = vsel %vm2581_vm4, %v693_v62, %v697_v53  ;;  %v1171_v16 = vrot.slane %v1169_v2, 4  ;;  %v1174_v18 = vrot.slane %v1172_v6, 5  ;;  %v2066_v23 = vcombine.low %v2653_v61, %v2653_v61  ;;  %v2704_v7 = vld [vmem:[%s2484_s18 + $0x30] sm:$0xf]  ;;  %v1112_v6 = vld [vmem:[%s2536_s12] sm:$0xf] }
  0x27   : > { %v2666_v24 = vmax.bf16 %v2645_v50, %v638_v12  ;;  %v712_v27 = vsel %vm2581_vm4, %v707_v9, %v711_v59  ;;  %v863_v28 = vmax.bf16 %v698_v1, %v635_v43  ;;  %v1161_v29 = vor.u32 %v1160_v13, %v1157_v63  ;;  %v2122_v43 = vld [vmem:[%s3130_s4 + $0xc] sm:$0x3]  ;;  %v2718_v59 = vld [vmem:[%s2659_s16 + $0x8] sm:$0xf] }
  0x28   : > { %v864_v32 = vmax.bf16 %v712_v27, %v636_v20  ;;  %v1175_v40 = vor.u32 %v1174_v18, %v1171_v16  ;;  %2230 = vmatmul.mubr.msk.bf16.vlgmr.msra.gmra.mxu1 %vm455_vm1, %v2066_v23  ;;  %v2080_v12 = vcombine.low %v2605_v11, %v2616_v19  ;;  %v2081_v44 = vcombine.low %v698_v1, %v712_v27  ;;  %v2698_v19 = vld [vmem:[%s2659_s16 + $0x18] sm:$0xf]  ;;  %v1115_v27 = vld [vmem:[%s2536_s12 + $0xc] sm:$0x1] }
  0x29   : > { %v985_v20 = vmax.bf16 %v2672_v34, %v863_v28  ;;  %v1162_v49 = vrot.slane %v1161_v29, 4  ;;  %v1166_v52 = vrot.slane %v1164_v14, 5  ;;  %v1180_v53 = vrot.slane %v1178_v15, 5  ;;  %2234 = vmatpush3.bf16.msra.mxu1 %v2493_v4  ;;  %2235 = vmatprep.mubr.msk.bf16.mxu1 %vm455_vm1, %v2071_v35  ;;  %v1114_v15 = vld [vmem:[%s2536_s12 + $0x8] sm:$0xf] }
  0x2a   : > { %v986_v11 = vmax.bf16 %v2675_v37, %v864_v32  ;;  %v1176_v55 = vrot.slane %v1175_v40, 4  ;;  %2319 = vmatprep.subr.msk.bf16.mxu1 %vm468_vm0, %v2498_v5  ;;  %2245 = vmatprep.mubr.msk.bf16.mxu0 %vm455_vm1, %v2080_v12  ;;  %v2082_v4 = vcombine.low %v2638_v36, %v2645_v50  ;;  %v742_v17 = vshrl.u32 %v652_v31, 16  ;;  %v2715_v5 = vld [vmem:[%s2659_s16] sm:$0xf]  ;;  %v2723_v36 = vld [vmem:[%s2536_s12 + $0x28] sm:$0xf] }
  0x2b   : > { %v983_v22 = vmax.bf16 %v2562_v38, %v2623_v33  ;;  %v2711_v35 = vmax.bf16 %v2689_v48, %v985_v20  ;;  %2246 = vmatmul.mubr.msk.bf16.vlgmr.msra.gmra.mxu0 %vm455_vm1, %v2081_v44  ;;  %v745_v56 = vshll.u32 %v652_v31, 16  ;;  %v751_v58 = vshll.u32 %v653_v46, 16  ;;  %v2772_v31 = vld [vmem:[%s2536_s12 + $0x30] sm:$0xf]  ;;  %v2775_v32 = vld [vmem:[%s2659_s16 + $0x20] sm:$0xf] }
  0x2c   : > { %v984_v60 = vmax.bf16 %v2565_v39, %v2627_v41  ;;  %v987_v33 = vmax.bf16 %v2685_v47, %v2650_v57  ;;  %v2728_v50 = vmax.bf16 %v2698_v19, %v986_v11  ;;  %2264 = vmatpush3.bf16.msra.mxu0 %v2544_v26  ;;  %2249 = vmatprep.mubr.msk.bf16.mxu0 %vm455_vm1, %v2082_v4  ;;  %v744_v62 = vrot.slane %v742_v17, 4  ;;  %v2791_v46 = vld [vmem:[%s2659_s16 + $0x30] sm:$0xf]  ;;  %v2802_v4 = vld [vmem:[%s2484_s18 + $0x8] sm:$0xf] }
  0x2d   : > { %v988_v63 = vmax.bf16 %v2723_v36, %v2666_v24  ;;  %v2090_v41 = vcombine.low %v2672_v34, %v2675_v37  ;;  %v2074_v2 = vcombine.low %v2704_v7, %v2704_v7  ;;  %v747_v57 = vrot.slane %v745_v56, 5  ;;  %2322 = vmatprep.subr.msk.bf16.mxu0 %vm468_vm0, %v2122_v43  ;;  %v1113_v24 = vld [vmem:[%s2536_s12 + $0x4] sm:$0x1]  ;;  %v1120_v17 = vld [vmem:[%s2536_s12 + $0x20] sm:$0xf] }
  0x2e   : > { %v2742_v26 = vsel %vm2581_vm4, %v1162_v49, %v1166_v52  ;;  %v2746_v9 = vsel %vm2581_vm4, %v1176_v55, %v1180_v53  ;;  %v639_v13 = vmax.bf16 %v2653_v61, %v2704_v7  ;;  %v2098_v14 = vcombine.low %v2715_v5, %v2718_v59 }
  0x2f   : > { %v1332_v1 = vmax.bf16 %v2742_v26, %v2711_v35  ;;  %v748_v16 = vor.u32 %v747_v57, %v744_v62  ;;  %v753_v18 = vrot.slane %v751_v58, 5  ;;  %v2756_v23 = vmax.bf16 %v2715_v5, %v983_v22  ;;  %v1122_v62 = vld [vmem:[%s2536_s12 + $0x28] sm:$0xf] }
  0x30   : > { %v1333_v28 = vmax.bf16 %v2746_v9, %v2728_v50  ;;  %2236 = vmatmul.mubr.msk.bf16.vlgmr.msra.gmra.mxu1 %vm455_vm1, %v2072_v42  ;;  %v2767_v61 = vmax.bf16 %v2718_v59, %v984_v60  ;;  %v2099_v29 = vcombine.low %v2689_v48, %v2698_v19  ;;  %v1127_v40 = vshrl.u32 %v1112_v6, 16  ;;  %v2786_v42 = vld [vmem:[%s2659_s16 + $0x28] sm:$0xf]  ;;  %v2814_v59 = vld [vmem:[%s2484_s18 + $0x10] sm:$0xf] }
  0x31   : > { %2254 = vmatpush3.bf16.msra.mxu1 %v2530_v21  ;;  %2239 = vmatprep.mubr.msk.bf16.mxu1 %vm455_vm1, %v2073_v0  ;;  %v749_v3 = vrot.slane %v748_v16, 4  ;;  %v2783_v25 = vsel %vm468_vm0, %v2122_v43, 0  ;;  %v1130_v12 = vshll.u32 %v1112_v6, 16  ;;  %v1141_v44 = vshrl.u32 %v1114_v15, 16  ;;  %v1121_v60 = vld [vmem:[%s2536_s12 + $0x24] sm:$0x1] }
  0x32   : > { %2321 = vmatprep.subr.msk.bf16.mxu1 %vm468_vm0, %v2511_v8  ;;  %v1129_v21 = vrot.slane %v1127_v40, 4  ;;  %v1136_v20 = vshll.u32 %v1113_v24, 16  ;;  %v1144_v45 = vshll.u32 %v1114_v15, 16  ;;  %v1150_v51 = vshll.u32 %v1115_v27, 16  ;;  %v2827_v16 = vld [vmem:[%s2484_s18 + $0x18] sm:$0xf] }
  0x33   : > { %v754_v0 = vsel %vm2581_vm4, %v749_v3, %v753_v18  ;;  %v2091_v43 = vcombine.low %v2685_v47, %v2723_v36  ;;  %v1132_v49 = vrot.slane %v1130_v12, 5  ;;  %v1143_v52 = vrot.slane %v1141_v44, 4  ;;  %v2831_v27 = vld [vmem:[%s2484_s18 + $0x20] sm:$0xf]  ;;  %v1123_v12 = vld [vmem:[%s2536_s12 + $0x2c] sm:$0x1] }
  0x34   : > { %v2083_v53 = vcombine.low %v754_v0, %v754_v0  ;;  %v2092_v8 = vcombine.low %v2772_v31, %v2772_v31  ;;  %v2100_v11 = vcombine.low %v2775_v32, %v2786_v42  ;;  %v1146_v55 = vrot.slane %v1144_v45, 5  ;;  %v2880_v35 = vld [vmem:[%s2484_s18 + $0x28] sm:$0xf] }
  0x35   : > { %v2806_v22 = vmax.bf16 %v2775_v32, %v987_v33  ;;  %v2809_v56 = vmax.bf16 %v2786_v42, %v988_v63  ;;  %v2101_v58 = vcombine.low %v2791_v46, %v2791_v46  ;;  %v1133_v5 = vor.u32 %v1132_v49, %v1129_v21  ;;  %v2822_v33 = vld [vmem:[%s3130_s4 + $0xe] sm:$0x3] }
  0x36   : > { %2250 = vmatmul.mubr.msk.bf16.gmra.mxu0 %vm455_vm1, %v2083_v53  ;;  %v1138_v57 = vrot.slane %v1136_v20, 5  ;;  %v1147_v6 = vor.u32 %v1146_v55, %v1143_v52  ;;  %v1152_v15 = vrot.slane %v1150_v51, 5  ;;  %v2108_v63 = vcombine.low %v2742_v26, %v2746_v9  ;;  %v1124_v20 = vld [vmem:[%s2536_s12 + $0x30] sm:$0xf]  ;;  %v1125_v53 = vld [vmem:[%s2536_s12 + $0x34] sm:$0x1] }
  0x37   : > { %v867_v18 = vmax.bf16 %v754_v0, %v639_v13  ;;  %2265 = vmatprep.mubr.msk.bf16.mxu0 %vm455_vm1, %v2098_v14  ;;  %v1134_v24 = vrot.slane %v1133_v5, 4  ;;  %v1183_v32 = vshrl.u32 %v1120_v17, 16  ;;  %v1186_v40 = vshll.u32 %v1120_v17, 16  ;;  %v2161_v17 = vld [vmem:[%s3130_s4 + $0x10] sm:$0x3] }
  0x38   : > { %2240 = vmatmul.mubr.msk.bf16.gmra.mxu1 %vm455_vm1, %v2074_v2  ;;  %v1148_v3 = vrot.slane %v1147_v6, 4  ;;  %v2123_v42 = vcombine.low %v2802_v4, %v2814_v59  ;;  %v1192_v44 = vshll.u32 %v1121_v60, 16  ;;  %v1197_v13 = vshrl.u32 %v1122_v62, 16 }
  0x39   : > { %2255 = vmatprep.mubr.msk.bf16.mxu1 %vm455_vm1, %v2089_v10  ;;  %v2846_v14 = vsel %vm468_vm0, %v2822_v33, 0  ;;  %v1185_v7 = vrot.slane %v1183_v32, 4  ;;  %v1188_v21 = vrot.slane %v1186_v40, 5  ;;  %v1200_v2 = vshll.u32 %v1122_v62, 16 }
  0x3a   : > { %v2851_v45 = vsel %vm2581_vm4, %v1134_v24, %v1138_v57  ;;  %v2855_v51 = vsel %vm2581_vm4, %v1148_v3, %v1152_v15  ;;  %v2124_v38 = vcombine.low %v2827_v16, %v2831_v27  ;;  %v1199_v39 = vrot.slane %v1197_v13, 4  ;;  %v2897_v3 = vld [vmem:[%s2484_s18 + $0x30] sm:$0xf] }
  0x3b   : > { %v1330_v10 = vmax.bf16 %v2851_v45, %v2756_v23  ;;  %v1189_v0 = vor.u32 %v1188_v21, %v1185_v7  ;;  %v1194_v49 = vrot.slane %v1192_v44, 5  ;;  %v1202_v52 = vrot.slane %v1200_v2, 5  ;;  %v2918_v44 = vld [vmem:[%s2490_s21 + $0x10] sm:$0xf]  ;;  %v2148_v7 = vld [vmem:[%s2484_s18 + $0xc] sm:$0x1] }
  0x3c   : > { %v1331_v55 = vmax.bf16 %v2855_v51, %v2767_v61  ;;  %v1206_v5 = vshll.u32 %v1123_v12, 16  ;;  %v1211_v60 = vshrl.u32 %v1124_v20, 16  ;;  %v1214_v62 = vshll.u32 %v1124_v20, 16  ;;  %v2147_v61 = vld [vmem:[%s2484_s18 + $0x8] sm:$0xf] }
  0x3d   : > { %v989_v57 = vmax.bf16 %v2772_v31, %v867_v18  ;;  %v2872_v23 = vmax.bf16 %v2827_v16, %v1332_v1  ;;  %v1190_v6 = vrot.slane %v1189_v0, 4  ;;  %v1203_v15 = vor.u32 %v1202_v52, %v1199_v39  ;;  %v2900_v12 = vld [vmem:[%s2484_s18 + $0x38] sm:$0xf]  ;;  %v2149_v2 = vld [vmem:[%s2484_s18 + $0x10] sm:$0xf] }
  0x3e   : > { %2266 = vmatmul.mubr.msk.bf16.vlgmr.msra.gmra.mxu0 %vm455_vm1, %v2099_v29  ;;  %v1208_v24 = vrot.slane %v1206_v5, 5  ;;  %v1213_v32 = vrot.slane %v1211_v60, 4  ;;  %v1216_v40 = vrot.slane %v1214_v62, 5  ;;  %v1220_v18 = vshll.u32 %v1125_v53, 16  ;;  %v2152_v60 = vld [vmem:[%s2484_s18 + $0x1c] sm:$0x1] }
  0x3f   : > { %2284 = vmatpush3.bf16.msra.mxu0 %v2783_v25  ;;  %2269 = vmatprep.mubr.msk.bf16.mxu0 %vm455_vm1, %v2100_v11  ;;  %v2885_v1 = vmax.bf16 %v2802_v4, %v1330_v10  ;;  %v2891_v48 = vmax.bf16 %v2831_v27, %v1333_v28  ;;  %v2894_v19 = vsel %vm468_vm0, %v2161_v17, 0  ;;  %v1204_v29 = vrot.slane %v1203_v15, 4  ;;  %v2915_v11 = vld [vmem:[%s2490_s21 + $0x8] sm:$0xf]  ;;  %v2153_v15 = vld [vmem:[%s2484_s18 + $0x20] sm:$0xf] }
  0x40   : > { %2256 = vmatmul.mubr.msk.bf16.vlgmr.msra.gmra.mxu1 %vm455_vm1, %v2090_v41  ;;  %v2907_v25 = vmax.bf16 %v2814_v59, %v1331_v55  ;;  %2324 = vmatprep.subr.msk.bf16.mxu0 %vm468_vm0, %v2161_v17  ;;  %v2912_v50 = vsel %vm2581_vm4, %v1190_v6, %v1194_v49  ;;  %v1217_v28 = vor.u32 %v1216_v40, %v1213_v32  ;;  %v1598_v13 = vshrl.u32 %v2147_v61, 16  ;;  %v2158_v27 = vld [vmem:[%s2484_s18 + $0x34] sm:$0x1] }
  0x41   : > { %2274 = vmatpush3.bf16.msra.mxu1 %v2548_v30  ;;  %2259 = vmatprep.mubr.msk.bf16.mxu1 %vm455_vm1, %v2091_v43  ;;  %v2926_v34 = vmax.bf16 %v2791_v46, %v989_v57  ;;  %v2930_v37 = vsel %vm2581_vm4, %v1204_v29, %v1208_v24  ;;  %v1334_v41 = vmax.bf16 %v2912_v50, %v2806_v22  ;;  %v1601_v21 = vshll.u32 %v2147_v61, 16  ;;  %v2154_v46 = vld [vmem:[%s2484_s18 + $0x24] sm:$0x1] }
  0x42   : > { %v2107_v30 = vcombine.low %v2851_v45, %v2855_v51  ;;  %2323 = vmatprep.subr.msk.bf16.mxu1 %vm468_vm0, %v2822_v33  ;;  %v1222_v47 = vrot.slane %v1220_v18, 5  ;;  %v2125_v36 = vcombine.low %v2880_v35, %v2897_v3  ;;  %v2126_v43 = vcombine.low %v2900_v12, %v2900_v12  ;;  %v2150_v45 = vld [vmem:[%s2484_s18 + $0x14] sm:$0x1]  ;;  %v2151_v33 = vld [vmem:[%s2484_s18 + $0x18] sm:$0xf] }
  0x43   : > { %v1218_v20 = vrot.slane %v1217_v28, 4  ;;  %v2139_v22 = vcombine.low %v2915_v11, %v2918_v44  ;;  %v1576_v39 = vmax.bf16 %v2915_v11, %v2885_v1  ;;  %v1600_v51 = vrot.slane %v1598_v13, 4 }
  0x44   : > { %v2109_v10 = vcombine.low %v2912_v50, %v2930_v37  ;;  %v1577_v0 = vmax.bf16 %v2918_v44, %v2907_v25  ;;  %v1603_v49 = vrot.slane %v1601_v21, 5  ;;  %v1607_v52 = vshll.u32 %v2148_v7, 16  ;;  %v2990_v7 = vld [vmem:[%s2490_s21 + $0x20] sm:$0xf]  ;;  %v2135_v50 = vld [vmem:[%s2490_s21 + $0x28] sm:$0xf] }
  0x45   : > { %v1335_v53 = vmax.bf16 %v2930_v37, %v2809_v56  ;;  %v2957_v55 = vmax.bf16 %v2880_v35, %v1334_v41  ;;  %v1612_v17 = vshrl.u32 %v2149_v2, 16  ;;  %v1615_v5 = vshll.u32 %v2149_v2, 16  ;;  %v2987_v41 = vld [vmem:[%s2490_s21 + $0x18] sm:$0xf] }
  0x46   : > { %2270 = vmatmul.mubr.msk.bf16.gmra.mxu0 %vm455_vm1, %v2101_v58  ;;  %v1604_v62 = vor.u32 %v1603_v49, %v1600_v51  ;;  %v1609_v57 = vrot.slane %v1607_v52, 5  ;;  %v1621_v6 = vshll.u32 %v2150_v45, 16  ;;  %v1626_v61 = vshrl.u32 %v2151_v33, 16 }
  0x47   : > { %2285 = vmatprep.mubr.msk.bf16.mxu0 %vm455_vm1, %v2123_v42  ;;  %v2971_v56 = vsel %vm2581_vm4, %v1218_v20, %v1222_v47  ;;  %v1614_v24 = vrot.slane %v1612_v17, 4  ;;  %v1617_v32 = vrot.slane %v1615_v5, 5  ;;  %v1629_v40 = vshll.u32 %v2151_v33, 16  ;;  %v2156_v33 = vld [vmem:[%s2484_s18 + $0x2c] sm:$0x1] }
  0x48   : > { %2260 = vmatmul.mubr.msk.bf16.gmra.mxu1 %vm455_vm1, %v2092_v8  ;;  %v1605_v58 = vrot.slane %v1604_v62, 4  ;;  %v1623_v4 = vrot.slane %v1621_v6, 5  ;;  %v1628_v59 = vrot.slane %v1626_v61, 4  ;;  %v1635_v42 = vshll.u32 %v2152_v60, 16  ;;  %v2159_v6 = vld [vmem:[%s2484_s18 + $0x38] sm:$0xf] }
  0x49   : > { %2275 = vmatprep.mubr.msk.bf16.mxu1 %vm455_vm1, %v2107_v30  ;;  %v1618_v18 = vor.u32 %v1617_v32, %v1614_v24  ;;  %v1631_v1 = vrot.slane %v1629_v40, 5  ;;  %v1640_v29 = vshrl.u32 %v2153_v15, 16  ;;  %v1643_v25 = vshll.u32 %v2153_v15, 16  ;;  %v2160_v61 = vld [vmem:[%s2484_s18 + $0x3c] sm:$0x1] }
  0x4a   : > { %v1336_v28 = vmax.bf16 %v2971_v56, %v2926_v34  ;;  %v2984_v31 = vsel %vm2581_vm4, %v1605_v58, %v1609_v57  ;;  %v1637_v8 = vrot.slane %v1635_v42, 5  ;;  %v1649_v13 = vshll.u32 %v2154_v46, 16 }
  0x4b   : > { %v1619_v21 = vrot.slane %v1618_v18, 4  ;;  %v1801_v30 = vmax.bf16 %v2984_v31, %v1576_v39  ;;  %v1632_v47 = vor.u32 %v1631_v1, %v1628_v59  ;;  %v1642_v2 = vrot.slane %v1640_v29, 4  ;;  %v2155_v39 = vld [vmem:[%s2484_s18 + $0x28] sm:$0xf]  ;;  %v2136_v1 = vld [vmem:[%s2490_s21 + $0x30] sm:$0xf] }
  0x4c   : > { %v2994_v34 = vmax.bf16 %v2897_v3, %v1335_v53  ;;  %v1578_v20 = vmax.bf16 %v2987_v41, %v2872_v23  ;;  %v1579_v45 = vmax.bf16 %v2990_v7, %v2891_v48  ;;  %v1645_v51 = vrot.slane %v1643_v25, 5  ;;  %v2157_v48 = vld [vmem:[%s2484_s18 + $0x30] sm:$0xf] }
  0x4d   : > { %v2110_v49 = vcombine.low %v2971_v56, %v2971_v56  ;;  %v1624_v23 = vsel %vm2581_vm4, %v1619_v21, %v1623_v4  ;;  %v1850_v52 = vunpack.c.l.bf16 %v1801_v30  ;;  %v1633_v53 = vrot.slane %v1632_v47, 4  ;;  %v2137_v30 = vld [vmem:[%s2490_s21 + $0x38] sm:$0xf] }
  0x4e   : > { %2286 = vmatmul.mubr.msk.bf16.vlgmr.msra.gmra.mxu0 %vm455_vm1, %v2124_v38  ;;  %v3019_v17 = vmax.bf16 %v2900_v12, %v1336_v28  ;;  %v1802_v5 = vmax.bf16 %v1624_v23, %v1577_v0  ;;  %v1646_v60 = vor.u32 %v1645_v51, %v1642_v2  ;;  %v1651_v62 = vrot.slane %v1649_v13, 5 }
  0x4f   : > { %2304 = vmatpush3.bf16.msra.mxu0 %v2894_v19  ;;  %2289 = vmatprep.mubr.msk.bf16.mxu0 %vm455_vm1, %v2125_v36  ;;  %1857 = vst.msk [vmem:[%s3005_s9] sm:$0xff] %vm455_vm1, %v1850_v52  ;;  %v3030_v16 = vsel %vm2581_vm4, %v1633_v53, %v1637_v8  ;;  %v1654_v38 = vshrl.u32 %v2155_v39, 16  ;;  %v1657_v0 = vshll.u32 %v2155_v39, 16  ;;  %v1663_v57 = vshll.u32 %v2156_v33, 16 }
  0x50   : > { %2276 = vmatmul.mubr.msk.bf16.vlgmr.msra.gmra.mxu1 %vm455_vm1, %v2108_v63  ;;  %v1851_v35 = vunpack.c.l.bf16 %v1802_v5  ;;  %v1647_v19 = vrot.slane %v1646_v60, 4  ;;  %v1803_v3 = vmax.bf16 %v3030_v16, %v1578_v20  ;;  %v1668_v36 = vshrl.u32 %v2157_v48, 16 }
  0x51   : > { %2294 = vmatpush3.bf16.msra.mxu1 %v2846_v14  ;;  %2279 = vmatprep.mubr.msk.bf16.mxu1 %vm455_vm1, %v2109_v10  ;;  %v2162_v15 = vcombine.low %v2984_v31, %v1624_v23  ;;  %v1656_v26 = vrot.slane %v1654_v38, 4  ;;  %v1659_v9 = vrot.slane %v1657_v0, 5  ;;  %v1671_v63 = vshll.u32 %v2157_v48, 16 }
  0x52   : > { %1858 = vst.msk [vmem:[%s3005_s9 + $0x8] sm:$0xff] %vm455_vm1, %v1851_v35  ;;  %v1652_v56 = vsel %vm2581_vm4, %v1647_v19, %v1651_v62  ;;  %v1852_v24 = vunpack.c.l.bf16 %v1803_v3  ;;  %v1670_v14 = vrot.slane %v1668_v36, 4  ;;  %v1677_v32 = vshll.u32 %v2158_v27, 16 }
  0x53   : > { %v1804_v46 = vmax.bf16 %v1652_v56, %v1579_v45  ;;  %v1660_v37 = vor.u32 %v1659_v9, %v1656_v26  ;;  %v1665_v10 = vrot.slane %v1663_v57, 5  ;;  %v1673_v40 = vrot.slane %v1671_v63, 5 }
  0x54   : > { %1859 = vst.msk [vmem:[%s3005_s9 + $0x10] sm:$0xff] %vm455_vm1, %v1852_v24  ;;  %v1580_v58 = vmax.bf16 %v2135_v50, %v2957_v55  ;;  %v1682_v4 = vshrl.u32 %v2159_v6, 16  ;;  %v1685_v59 = vshll.u32 %v2159_v6, 16  ;;  %v1691_v42 = vshll.u32 %v2160_v61, 16 }
  0x55   : > { %v1853_v18 = vunpack.c.l.bf16 %v1804_v46  ;;  %v1661_v29 = vrot.slane %v1660_v37, 4  ;;  %v1674_v25 = vor.u32 %v1673_v40, %v1670_v14  ;;  %v1679_v28 = vrot.slane %v1677_v32, 5 }
  0x56   : > { %2290 = vmatmul.mubr.msk.bf16.gmra.mxu0 %vm455_vm1, %v2126_v43  ;;  %v1581_v31 = vmax.bf16 %v2136_v1, %v2994_v34  ;;  %v1684_v8 = vrot.slane %v1682_v4, 4  ;;  %v1687_v13 = vrot.slane %v1685_v59, 5  ;;  %v1693_v2 = vrot.slane %v1691_v42, 5 }
  0x57   : > { %2305 = vmatprep.mubr.msk.bf16.mxu0 %vm455_vm1, %v2162_v15  ;;  %1860 = vst.msk [vmem:[%s3005_s9 + $0x18] sm:$0xff] %vm455_vm1, %v1853_v18  ;;  %v1666_v55 = vsel %vm2581_vm4, %v1661_v29, %v1665_v10  ;;  %v1675_v21 = vrot.slane %v1674_v25, 4  ;;  %v1582_v43 = vmax.bf16 %v2137_v30, %v3019_v17  ;;  %v2163_v20 = vcombine.low %v3030_v16, %v1652_v56 }
  0x58   : > { %2280 = vmatmul.mubr.msk.bf16.gmra.mxu1 %vm455_vm1, %v2110_v49  ;;  %v1805_v47 = vmax.bf16 %v1666_v55, %v1580_v58  ;;  %v1688_v12 = vor.u32 %v1687_v13, %v1684_v8  ;;  %v2140_v49 = vcombine.low %v2987_v41, %v2990_v7  ;;  %v2141_v44 = vcombine.low %v2135_v50, %v2136_v1 }
  0x59   : > { %2295 = vmatprep.mubr.msk.bf16.mxu1 %vm455_vm1, %v2139_v22  ;;  %v1680_v34 = vsel %vm2581_vm4, %v1675_v21, %v1679_v28  ;;  %v2142_v7 = vcombine.low %v2137_v30, %v2137_v30 }
  0x5a   : > { %v1806_v45 = vmax.bf16 %v1680_v34, %v1581_v31  ;;  %v1854_v51 = vunpack.c.l.bf16 %v1805_v47  ;;  %v1689_v39 = vrot.slane %v1688_v12, 4  ;;  %v2164_v33 = vcombine.low %v1666_v55, %v1680_v34 }
  0x5c   : > { %v1855_v23 = vunpack.c.l.bf16 %v1806_v45  ;;  %1861 = vst.msk [vmem:[%s3005_s9 + $0x20] sm:$0xff] %vm455_vm1, %v1854_v51  ;;  %v1694_v11 = vsel %vm2581_vm4, %v1689_v39, %v1693_v2 }
  0x5d   : > { %v1807_v22 = vmax.bf16 %v1694_v11, %v1582_v43  ;;  %v2165_v41 = vcombine.low %v1694_v11, %v1694_v11 }
  0x5e   : > { %2306 = vmatmul.mubr.msk.bf16.vlgmr.msra.gmra.mxu0 %vm455_vm1, %v2163_v20  ;;  %1862 = vst.msk [vmem:[%s3005_s9 + $0x28] sm:$0xff] %vm455_vm1, %v1855_v23 }
  0x5f   : > { %2309 = vmatprep.mubr.msk.bf16.mxu0 %vm455_vm1, %v2164_v33  ;;  %v1856_v52 = vunpack.c.l.bf16 %v1807_v22 }
  0x60   : > { %2296 = vmatmul.mubr.msk.bf16.vlgmr.msra.gmra.mxu1 %vm455_vm1, %v2140_v49 }
  0x61   : > { %2299 = vmatprep.mubr.msk.bf16.mxu1 %vm455_vm1, %v2141_v44  ;;  %1863 = vst.msk [vmem:[%s3005_s9 + $0x30] sm:$0xff] %vm455_vm1, %v1856_v52 }
  0x66   : > { %2310 = vmatmul.mubr.msk.bf16.gmra.mxu0 %vm455_vm1, %v2165_v41 }
  0x68   : > { %2300 = vmatmul.mubr.msk.bf16.gmra.mxu1 %vm455_vm1, %v2142_v7 }
  0xde   : > { %v2227_v54 = vpop.f32.mrf.mxu0 }
  0xe0   : > { %v506_v53 = vpop.f32.mrf.mxu0 }
  0xe2   : > { %v2228_v48 = vpop.f32.mrf.mxu0 }
  0xe4   : > { %v509_v17 = vpop.f32.mrf.mxu0 }
  0xe8   : > { %v2231_v5 = vpop.f32.mrf.mxu1 }
  0xea   : > { %v522_v60 = vpop.f32.mrf.mxu1 }
  0xeb   : > { %v2247_v62 = vpop.f32.mrf.mxu0 }
  0xec   : > { %v2232_v16 = vpop.f32.mrf.mxu1 }
  0xed   : > { %v824_v27 = vpop.f32.mrf.mxu0 }
  0xee   : > { %v3091_v38 = vpop.f32.mrf.mxu1 }
  0xef   : > { %v2248_v0 = vpop.f32.mrf.mxu0 }
  0xf0   : > { %v2237_v57 = vpop.f32.mrf.mxu1 }
  0xf1   : > { %v827_v19 = vpop.f32.mrf.mxu0  ;;  %v612_v8 = vadd.f32 %v2237_v57, %v2227_v54 }
  0xf2   : > { %v603_v35 = vpop.f32.mrf.mxu1 }
  0xf3   : > { %v604_v21 = vadd.f32 %v603_v35, %v506_v53  ;;  %v856_v12 = vadd.f32 %v2247_v62, %v612_v8 }
  0xf4   : > { %v2238_v3 = vpop.f32.mrf.mxu1 }
  0xf5   : > { %v615_v2 = vadd.f32 %v2238_v3, %v2228_v48  ;;  %v854_v20 = vadd.f32 %v824_v27, %v604_v21 }
  0xf6   : > { %v606_v36 = vpop.f32.mrf.mxu1  ;;  %v2251_v6 = vpop.f32.mrf.mxu0 }
  0xf7   : > { %v607_v45 = vadd.f32 %v606_v36, %v509_v17  ;;  %v857_v49 = vadd.f32 %v2248_v0, %v615_v2 }
  0xf8   : > { %v2241_v15 = vpop.f32.mrf.mxu1  ;;  %v840_v26 = vpop.f32.mrf.mxu0 }
  0xf9   : > { %v628_v11 = vadd.f32 %v2241_v15, %v2231_v5  ;;  %v855_v41 = vadd.f32 %v827_v19, %v607_v45 }
  0xfa   : > { %v619_v9 = vpop.f32.mrf.mxu1  ;;  %v2252_v63 = vpop.f32.mrf.mxu0 }
  0xfb   : > { %v620_v44 = vadd.f32 %v619_v9, %v522_v60  ;;  %v860_v35 = vadd.f32 %v2251_v6, %v628_v11 }
  0xfc   : > { %v2242_v61 = vpop.f32.mrf.mxu1  ;;  %v843_v56 = vpop.f32.mrf.mxu0 }
  0xfd   : > { %v858_v27 = vadd.f32 %v840_v26, %v620_v44 }
  0xfe   : > { %v622_v24 = vpop.f32.mrf.mxu1  ;;  %v2267_v14 = vpop.f32.mrf.mxu0 }
  0xff   : > { %v623_v17 = vadd.f32 %v622_v24, %v3091_v38  ;;  %v2170_v24 = vld [vmem:[%s3131_s5] ss:$0 sm:$0xff] }
 0x100   : > { %v2257_v32 = vpop.f32.mrf.mxu1  ;;  %v1068_v46 = vpop.f32.mrf.mxu0 }
 0x101   : > { %v978_v51 = vadd.f32 %v2257_v32, %v856_v12  ;;  %v859_v32 = vadd.f32 %v843_v56, %v623_v17  ;;  %v2171_v56 = vld [vmem:[%s3132_s6] ss:$0 sm:$0xff] }
 0x102   : > { %v946_v50 = vpop.f32.mrf.mxu1  ;;  %v2268_v37 = vpop.f32.mrf.mxu0 }
 0x103   : > { %v976_v23 = vadd.f32 %v946_v50, %v854_v20  ;;  %v1100_v7 = vadd.f32 %v2267_v14, %v978_v51 }
 0x104   : > { %v2258_v10 = vpop.f32.mrf.mxu1  ;;  %v1071_v40 = vpop.f32.mrf.mxu0 }
 0x105   : > { %v979_v54 = vadd.f32 %v2258_v10, %v857_v49  ;;  %v1098_v62 = vadd.f32 %v1068_v46, %v976_v23 }
 0x106   : > { %v949_v58 = vpop.f32.mrf.mxu1  ;;  %v2271_v4 = vpop.f32.mrf.mxu0 }
 0x107   : > { %v977_v48 = vadd.f32 %v949_v58, %v855_v41  ;;  %v1101_v0 = vadd.f32 %v2268_v37, %v979_v54 }
 0x108   : > { %v2261_v59 = vpop.f32.mrf.mxu1  ;;  %v1084_v42 = vpop.f32.mrf.mxu0 }
 0x109   : > { %v982_v5 = vadd.f32 %v2261_v59, %v860_v35  ;;  %v1099_v19 = vadd.f32 %v1071_v40, %v977_v48 }
 0x10a   : > { %v962_v18 = vpop.f32.mrf.mxu1  ;;  %v2272_v1 = vpop.f32.mrf.mxu0 }
 0x10b   : > { %v980_v60 = vadd.f32 %v962_v18, %v858_v27  ;;  %v1104_v26 = vadd.f32 %v2271_v4, %v982_v5 }
 0x10c   : > { %v2262_v29 = vpop.f32.mrf.mxu1  ;;  %v3093_v25 = vpop.f32.mrf.mxu0 }
 0x10d   : > { %v1102_v1 = vadd.f32 %v1084_v42, %v980_v60 }
 0x10e   : > { %v965_v28 = vpop.f32.mrf.mxu1  ;;  %v2287_v31 = vpop.f32.mrf.mxu0 }
 0x10f   : > { %v981_v38 = vadd.f32 %v965_v28, %v859_v32 }
 0x110   : > { %v2277_v13 = vpop.f32.mrf.mxu1  ;;  %v1417_v55 = vpop.f32.mrf.mxu0 }
 0x111   : > { %v1325_v57 = vadd.f32 %v2277_v13, %v1100_v7 }
 0x112   : > { %v1293_v30 = vpop.f32.mrf.mxu1  ;;  %v2288_v47 = vpop.f32.mrf.mxu0 }
 0x113   : > { %v1323_v63 = vadd.f32 %v1293_v30, %v1098_v62  ;;  %v1449_v61 = vadd.f32 %v2287_v31, %v1325_v57  ;;  %v1103_v30 = vadd.f32 %v3093_v25, %v981_v38 }
 0x114   : > { %v2278_v43 = vpop.f32.mrf.mxu1  ;;  %v1420_v34 = vpop.f32.mrf.mxu0 }
 0x115   : > { %v1326_v14 = vadd.f32 %v2278_v43, %v1101_v0  ;;  %v1447_v10 = vadd.f32 %v1417_v55, %v1323_v63 }
 0x116   : > { %v1296_v39 = vpop.f32.mrf.mxu1  ;;  %v2291_v33 = vpop.f32.mrf.mxu0 }
 0x117   : > { %v1324_v58 = vadd.f32 %v1296_v39, %v1099_v19  ;;  %v1450_v18 = vadd.f32 %v2288_v47, %v1326_v14 }
 0x118   : > { %v2281_v22 = vpop.f32.mrf.mxu1  ;;  %v1433_v52 = vpop.f32.mrf.mxu0 }
 0x119   : > { %v1329_v31 = vadd.f32 %v2281_v22, %v1104_v26  ;;  %v1448_v42 = vadd.f32 %v1420_v34, %v1324_v58 }
 0x11a   : > { %v1309_v53 = vpop.f32.mrf.mxu1  ;;  %v2292_v16 = vpop.f32.mrf.mxu0 }
 0x11b   : > { %v1327_v8 = vadd.f32 %v1309_v53, %v1102_v1  ;;  %v1453_v51 = vadd.f32 %v2291_v33, %v1329_v31 }
 0x11c   : > { %v2282_v3 = vpop.f32.mrf.mxu1  ;;  %v1436_v36 = vpop.f32.mrf.mxu0 }
 0x11d   : > { %v1451_v39 = vadd.f32 %v1433_v52, %v1327_v8 }
 0x11e   : > { %v1312_v15 = vpop.f32.mrf.mxu1  ;;  %v2307_v9 = vpop.f32.mrf.mxu0 }
 0x11f   : > { %v1328_v49 = vadd.f32 %v1312_v15, %v1103_v30 }
 0x120   : > { %v2297_v50 = vpop.f32.mrf.mxu1  ;;  %v1764_v46 = vpop.f32.mrf.mxu0 }
 0x121   : > { %v1571_v6 = vadd.f32 %v2297_v50, %v1449_v61  ;;  %v1452_v57 = vadd.f32 %v1436_v36, %v1328_v49 }
 0x122   : > { %v1539_v37 = vpop.f32.mrf.mxu1  ;;  %v2308_v59 = vpop.f32.mrf.mxu0 }
 0x123   : > { %v1796_v29 = vadd.f32 %v2307_v9, %v1571_v6  ;;  %v1569_v40 = vadd.f32 %v1539_v37, %v1447_v10 }
 0x124   : > { %v2298_v13 = vpop.f32.mrf.mxu1  ;;  %v1767_v4 = vpop.f32.mrf.mxu0 }
 0x125   : > { %v1817_v28 = vmul.f32 %v2170_v24, %v1796_v29  ;;  %v1794_v55 = vadd.f32 %v1764_v46, %v1569_v40  ;;  %v1572_v21 = vadd.f32 %v2298_v13, %v1450_v18 }
 0x126   : > { %v1542_v12 = vpop.f32.mrf.mxu1  ;;  %v2311_v2 = vpop.f32.mrf.mxu0 }
 0x127   : > { %v1831_v47 = vadd.f32 %v2171_v56, %v1817_v28  ;;  %v1815_v43 = vmul.f32 %v2170_v24, %v1794_v55  ;;  %v1797_v20 = vadd.f32 %v2308_v59, %v1572_v21  ;;  %v1570_v45 = vadd.f32 %v1542_v12, %v1448_v42 }
 0x128   : > { %v2301_v34 = vpop.f32.mrf.mxu1  ;;  %v1780_v23 = vpop.f32.mrf.mxu0 }
 0x129   : > { %v1838_v25 = vmax.f32 %v1831_v47, 0.0  ;;  %v1829_v11 = vadd.f32 %v2171_v56, %v1815_v43  ;;  %v1818_v44 = vmul.f32 %v2170_v24, %v1797_v20  ;;  %v1795_v22 = vadd.f32 %v1767_v4, %v1570_v45 }
 0x12a   : > { %v1575_v41 = vadd.f32 %v2301_v34, %v1453_v51  ;;  %v1555_v7 = vpop.f32.mrf.mxu1  ;;  %v2312_v54 = vpop.f32.mrf.mxu0 }
 0x12b   : > { %1845 = vst [vmem:[%s3108_s14 + $0x10] sm:$0xff] %v1838_v25  ;;  %v1836_v33 = vmax.f32 %v1829_v11, 0.0  ;;  %v1832_v52 = vadd.f32 %v2171_v56, %v1818_v44  ;;  %v1816_v53 = vmul.f32 %v2170_v24, %v1795_v22  ;;  %v1573_v16 = vadd.f32 %v1555_v7, %v1451_v39 }
 0x12c   : > { %v1800_v62 = vadd.f32 %v2311_v2, %v1575_v41  ;;  %v2302_v48 = vpop.f32.mrf.mxu1  ;;  %v1783_v63 = vpop.f32.mrf.mxu0 }
 0x12d   : > { %1843 = vst [vmem:[%s3108_s14] sm:$0xff] %v1836_v33  ;;  %v1839_v35 = vmax.f32 %v1832_v52, 0.0  ;;  %v1830_v27 = vadd.f32 %v2171_v56, %v1816_v53  ;;  %v1798_v17 = vadd.f32 %v1780_v23, %v1573_v16 }
 0x12e   : > { %v1821_v3 = vmul.f32 %v2170_v24, %v1800_v62  ;;  %v1558_v0 = vpop.f32.mrf.mxu1 }
 0x12f   : > { %1846 = vst [vmem:[%s3108_s14 + $0x18] sm:$0xff] %v1839_v35  ;;  %v1837_v5 = vmax.f32 %v1830_v27, 0.0  ;;  %v1819_v60 = vmul.f32 %v2170_v24, %v1798_v17  ;;  %v1574_v15 = vadd.f32 %v1558_v0, %v1452_v57 }
 0x130   : > { %v1835_v9 = vadd.f32 %v2171_v56, %v1821_v3 }
 0x131   : > { %1844 = vst [vmem:[%s3108_s14 + $0x8] sm:$0xff] %v1837_v5  ;;  %v1833_v19 = vadd.f32 %v2171_v56, %v1819_v60  ;;  %v1799_v61 = vadd.f32 %v1783_v63, %v1574_v15 }
 0x132   : > { %v1842_v14 = vmax.f32 %v1835_v9, 0.0 }
 0x133   : > { %v1840_v36 = vmax.f32 %v1833_v19, 0.0  ;;  %v1820_v32 = vmul.f32 %v2170_v24, %v1799_v61 }
 0x134   : > { %1849 = vst [vmem:[%s3108_s14 + $0x30] sm:$0xff] %v1842_v14 }
 0x135   : > { %1847 = vst [vmem:[%s3108_s14 + $0x20] sm:$0xff] %v1840_v36  ;;  %v1834_v50 = vadd.f32 %v2171_v56, %v1820_v32 }
 0x137   : > { %v1841_v46 = vmax.f32 %v1834_v50, 0.0 }
 0x139   : > { %1848 = vst [vmem:[%s3108_s14 + $0x28] sm:$0xff] %v1841_v46 }
 0x13a PF: > { %s19_s29 = sadd.s32 1, %s2396_s29   ;;  %s3137_s27 = smov %s2392_s28 }
 0x13b   : > { %p16_p5 = scmp.ge.s32.totalorder %s19_s29, 4   ;;  %s3138_s28 = smov %s3140_s30 }
 0x13d   :  { %18 = sbr.rel (!%p16_p5) target bundleno = 2 (0x2), region = 113 }

</bundles_post_ra>
